<compile_context>
chip_gen: v7x
topology: tpu7x:2x2x1
jax: 0.10.0
libtpu: 0.0.40
codegen_flags: <defaults>
</compile_context>

<pallas_src>
import jax
import jax.numpy as jnp
from jax.experimental import pallas as pl
from jax.experimental.pallas import tpu as pltpu

N = 8            # A_S / A_F / A1 are 8x8 (matches torch.eye(8) in the module)
FLAT = N * N     # 64
FEAT = 200       # Linear(200, 1) input feature size
FEAT_PAD = 256   # 2 full 128-lane vregs; pad lanes zero except lane FEAT (bias fold)

# Packed (8, 256) f32 VMEM input row layout:
#   row 0: H         (lanes 0..199), lane 200 = 1.0, lanes 201..255 = 0
#   row 1: X_sensor  (lanes 0..199), lane 200 = 1.0, lanes 201..255 = 0
#   row 2: A_S flattened (lanes 0..63), rest 0
#   row 3: A_F flattened (lanes 0..63), rest 0
#   row 4: A1  flattened (lanes 0..63), rest 0
#   row 5: w1        (lanes 0..199), lane 200 = b1, rest 0        [static]
#   row 6: w2        (lanes 0..199), lane 200 = b2, rest 0        [static]
#   row 7: diag mask: 1.0 at lanes 0,9,18,...,63, rest 0          [static]


def frob_kernel(p_ref, out_ref):
    p = p_ref[...]                                            # (8, 256)

    # Gate pre-activations; biases are folded into lane FEAT by the packing:
    #   pre[0] = H @ w1 + b1 (layer1), pre[1] = X_sensor @ w2 + b2 (layer2)
    prod = p[0:2, :] * p[5:7, :]                              # one (2,256) VPU mul
    pre = jnp.sum(prod, axis=-1, keepdims=True)               # (2, 1) lane reduce

    # Fused Frobenius norms of (A1 - A_S) and (A1 - A_F) on 64-lane rows.
    diffs = p[4:5, :] - p[2:4, :]                             # (2, 256)
    nrm = jnp.sqrt(jnp.sum(diffs * diffs, axis=-1, keepdims=True))  # (2, 1)
    n1 = nrm[0, 0]
    n2 = nrm[1, 0]
    inv_tot = 1.0 / (n1 + n2)          # exact divide: no slot is EUP/VALU-bound here
    c1 = n1 * inv_tot
    c2 = n2 * inv_tot

    # Select-before-sigmoid is exact; strict '>' matches the torch branch
    # (tie n1 == n2 takes the X_sensor / layer2 path, as in the reference).
    gate = jax.nn.sigmoid(jnp.where(n1 > n2, pre[0, 0], pre[1, 0]))

    # Diagonal-masked combination, kept lane-flat; row 7 is the diag mask.
    combo = (gate * (c2 * p[2:3, :] + c1 * p[3:4, :])) * p[7:8, :]   # (1, 256)
    out_ref[...] = combo[:, 0:FLAT]                           # flat (1, 64) output


def build_static_rows(w1, b1, w2, b2):
    """Pre-pack the parameter rows once at module-init time."""
    w1 = jnp.asarray(w1, jnp.float32).reshape(1, FEAT)
    w2 = jnp.asarray(w2, jnp.float32).reshape(1, FEAT)
    b = jnp.stack([jnp.asarray(b1, jnp.float32).reshape(()),
                   jnp.asarray(b2, jnp.float32).reshape(())]).reshape(2, 1)
    w_rows = jnp.concatenate(
        [jnp.concatenate([w1, w2], axis=0), b,
         jnp.zeros((2, FEAT_PAD - FEAT - 1), jnp.float32)], axis=1)        # (2, 256)
    diag = jnp.zeros((1, FEAT_PAD), jnp.float32).at[
        0, jnp.arange(N) * (N + 1)].set(1.0)                               # (1, 256)
    return jnp.concatenate([w_rows, diag], axis=0)                         # (3, 256)


@jax.jit
def frob_forward(A_S, A_F, A1, X_sensor, H, static_rows):
    # Per-call packing of the dynamic rows only (constants below fold in XLA).
    feat_pad = jnp.concatenate(
        [jnp.ones((2, 1), jnp.float32),
         jnp.zeros((2, FEAT_PAD - FEAT - 1), jnp.float32)], axis=1)        # (2, 56)
    feat_rows = jnp.concatenate(
        [jnp.concatenate([H, X_sensor], axis=0).astype(jnp.float32), feat_pad],
        axis=1)                                                            # (2, 256)
    mat_rows = jnp.concatenate(
        [A_S.reshape(1, FLAT), A_F.reshape(1, FLAT), A1.reshape(1, FLAT)],
        axis=0).astype(jnp.float32)
    mat_rows = jnp.pad(mat_rows, ((0, 0), (0, FEAT_PAD - FLAT)))           # (3, 256)
    packed = jnp.concatenate([feat_rows, mat_rows, static_rows], axis=0)   # (8, 256)

    out_flat = pl.pallas_call(
        frob_kernel,
        out_shape=jax.ShapeDtypeStruct((1, FLAT), jnp.float32),
        in_specs=[pl.BlockSpec(memory_space=pltpu.MemorySpace.VMEM)],
        out_specs=pl.BlockSpec(memory_space=pltpu.MemorySpace.VMEM),
        cost_estimate=pl.CostEstimate(
            flops=1300, transcendentals=4,
            bytes_accessed=8 * FEAT_PAD * 4 + FLAT * 4),
    )(packed)
    return out_flat.reshape(N, N)   # free metadata reshape in the wrapper


if __name__ == "__main__":
    key = jax.random.PRNGKey(0)
    k = jax.random.split(key, 9)

    # Module inputs (small, deterministic).
    A_S = jax.random.normal(k[0], (N, N), dtype=jnp.float32)
    A_F = jax.random.normal(k[1], (N, N), dtype=jnp.float32)
    A1 = jax.random.normal(k[2], (N, N), dtype=jnp.float32)
    X_sensor = jax.random.normal(k[3], (1, FEAT), dtype=jnp.float32)
    H = jax.random.normal(k[4], (1, FEAT), dtype=jnp.float32)

    # Deterministic parameters matching nn.Linear(200, 1) shapes
    # (weights stored as (1, 200), biases as (1,)).
    bound = 1.0 / jnp.sqrt(jnp.float32(FEAT))
    w1 = jax.random.uniform(k[5], (1, FEAT), jnp.float32, -bound, bound)
    b1 = jax.random.uniform(k[6], (1,), jnp.float32, -bound, bound)
    w2 = jax.random.uniform(k[7], (1, FEAT), jnp.float32, -bound, bound)
    b2 = jax.random.uniform(k[8], (1,), jnp.float32, -bound, bound)

    # Static rows packed once ("module init"), reused across calls.
    static_rows = build_static_rows(w1, b1, w2, b2)

    out = frob_forward(A_S, A_F, A1, X_sensor, H, static_rows)
    jax.block_until_ready(out)

    # Pure-JAX reference of the same forward (exact divide, both branches).
    d1 = A1 - A_S
    d2 = A1 - A_F
    n1 = jnp.sqrt(jnp.sum(d1 * d1))
    n2 = jnp.sqrt(jnp.sum(d2 * d2))
    c1 = n1 / (n1 + n2)
    c2 = n2 / (n1 + n2)
    eye = jnp.eye(N, dtype=jnp.float32)
    base = c2 * (A_S * eye) + c1 * (A_F * eye)
    aF = jax.nn.sigmoid(jnp.sum(H * w1) + b1[0])
    aS = jax.nn.sigmoid(jnp.sum(X_sensor * w2) + b2[0])
    ref = jnp.where(n1 > n2, aF, aS) * base

    # Exact divide in the kernel -> tight tolerance (only reduction-order noise).
    assert jnp.allclose(out, ref, atol=1e-4, rtol=1e-4)

    print("KERNEL_OK")
</pallas_src>

<mosaic_0001>
module attributes {stable_mosaic.version = 11 : i64} {
  func.func @frob_kernel(%arg0: memref<8x256xf32, #tpu.memory_space<vmem>>, %arg1: memref<1x64xf32, #tpu.memory_space<vmem>>) attributes {dimension_semantics = [], scalar_prefetch = 0 : i64, scratch_operands = 0 : i64, tpu.core_type = #tpu.core_type<tc>} {
    %c0 = arith.constant 0 : index
    %c0_0 = arith.constant 0 : index
    %0 = vector.load %arg0[%c0, %c0_0] : memref<8x256xf32, #tpu.memory_space<vmem>>, vector<8x256xf32>
    %1 = vector.extract_strided_slice %0 {offsets = [0, 0], sizes = [2, 256], strides = [1, 1]} : vector<8x256xf32> to vector<2x256xf32>
    %2 = vector.extract_strided_slice %0 {offsets = [5, 0], sizes = [2, 256], strides = [1, 1]} : vector<8x256xf32> to vector<2x256xf32>
    %3 = arith.mulf %1, %2 : vector<2x256xf32>
    %cst = arith.constant dense<0.000000e+00> : vector<2xf32>
    %4 = vector.multi_reduction <add>, %3, %cst [1] : vector<2x256xf32> to vector<2xf32>
    %5 = vector.shape_cast %4 : vector<2xf32> to vector<2x1xf32>
    %6 = vector.extract_strided_slice %0 {offsets = [4, 0], sizes = [1, 256], strides = [1, 1]} : vector<8x256xf32> to vector<1x256xf32>
    %7 = vector.extract_strided_slice %0 {offsets = [2, 0], sizes = [2, 256], strides = [1, 1]} : vector<8x256xf32> to vector<2x256xf32>
    %8 = vector.broadcast %6 : vector<1x256xf32> to vector<2x256xf32>
    %9 = arith.subf %8, %7 : vector<2x256xf32>
    %10 = arith.mulf %9, %9 : vector<2x256xf32>
    %cst_1 = arith.constant dense<0.000000e+00> : vector<2xf32>
    %11 = vector.multi_reduction <add>, %10, %cst_1 [1] : vector<2x256xf32> to vector<2xf32>
    %12 = vector.shape_cast %11 : vector<2xf32> to vector<2x1xf32>
    %13 = math.sqrt %12 : vector<2x1xf32>
    %14 = vector.extract_strided_slice %13 {offsets = [0, 0], sizes = [1, 1], strides = [1, 1]} : vector<2x1xf32> to vector<1x1xf32>
    %15 = vector.extract %14[0, 0] : f32 from vector<1x1xf32>
    %16 = vector.extract_strided_slice %13 {offsets = [1, 0], sizes = [1, 1], strides = [1, 1]} : vector<2x1xf32> to vector<1x1xf32>
    %17 = vector.extract %16[0, 0] : f32 from vector<1x1xf32>
    %18 = arith.addf %15, %17 : f32
    %cst_2 = arith.constant 1.000000e+00 : f32
    %19 = arith.divf %cst_2, %18 : f32
    %20 = arith.mulf %15, %19 : f32
    %21 = arith.mulf %17, %19 : f32
    %22 = arith.cmpf ogt, %15, %17 : f32
    %23 = vector.extract_strided_slice %5 {offsets = [0, 0], sizes = [1, 1], strides = [1, 1]} : vector<2x1xf32> to vector<1x1xf32>
    %24 = vector.extract %23[0, 0] : f32 from vector<1x1xf32>
    %25 = vector.extract_strided_slice %5 {offsets = [1, 0], sizes = [1, 1], strides = [1, 1]} : vector<2x1xf32> to vector<1x1xf32>
    %26 = vector.extract %25[0, 0] : f32 from vector<1x1xf32>
    %27 = arith.select %22, %24, %26 : f32
    %28 = arith.negf %27 : f32
    %29 = math.exp %28 : f32
    %cst_3 = arith.constant 1.000000e+00 : f32
    %30 = arith.addf %cst_3, %29 : f32
    %31 = arith.divf %cst_3, %30 : f32
    %32 = vector.extract_strided_slice %0 {offsets = [2, 0], sizes = [1, 256], strides = [1, 1]} : vector<8x256xf32> to vector<1x256xf32>
    %33 = vector.broadcast %21 : f32 to vector<1x256xf32>
    %34 = arith.mulf %33, %32 : vector<1x256xf32>
    %35 = vector.extract_strided_slice %0 {offsets = [3, 0], sizes = [1, 256], strides = [1, 1]} : vector<8x256xf32> to vector<1x256xf32>
    %36 = vector.broadcast %20 : f32 to vector<1x256xf32>
    %37 = arith.mulf %36, %35 : vector<1x256xf32>
    %38 = arith.addf %34, %37 : vector<1x256xf32>
    %39 = vector.broadcast %31 : f32 to vector<1x256xf32>
    %40 = arith.mulf %39, %38 : vector<1x256xf32>
    %41 = vector.extract_strided_slice %0 {offsets = [7, 0], sizes = [1, 256], strides = [1, 1]} : vector<8x256xf32> to vector<1x256xf32>
    %42 = arith.mulf %40, %41 : vector<1x256xf32>
    %43 = vector.extract_strided_slice %42 {offsets = [0, 0], sizes = [1, 64], strides = [1, 1]} : vector<1x256xf32> to vector<1x64xf32>
    %c0_4 = arith.constant 0 : index
    %c0_5 = arith.constant 0 : index
    %44 = vector.load %arg1[%c0_4, %c0_5] : memref<1x64xf32, #tpu.memory_space<vmem>>, vector<1x64xf32>
    tpu.vector_store %arg1[%c0_4, %c0_5], %43 {strides = array<i32>} : memref<1x64xf32, #tpu.memory_space<vmem>>, vector<1x64xf32>,
    return
  }
}

</mosaic_0001>

<bundles_post_ra>
// kernel: frob_forward.1
= control target key start
LH: loop header
LB: loop body
LE: loop exit
PB: predicated region body
PF: predicated region fallthrough
CT: control target
= control target key end

     0   :  { %v24_v0 = vlaneseq  ;;  %vm36_vm0 = vcmask 1043458   ;;  %vm18_vm1 = vcmask 1041408   ;;  %vm86_vm4 = vcmask 518146   ;;  %s155_s0 = inlined_call_operand.vmem [shape: f32[8,256], index: 0, kind: input, shape index: {}]   ;;  %s156_s1 = inlined_call_operand.vmem [shape: f32[1,64], index: 1, kind: output, shape index: {}]  }
   0x1   :  { %v127_v2 = vld [vmem:[%s155_s0] sm:$0xff]  ;;  %v9_v3 = vld [vmem:[%s155_s0 + $0x8] sm:$0xff] }
   0x2   :  { %v25_v1 = vshrl.u32 %v24_v0, 7  ;;  %v12_v5 = vrot.slane %v127_v2, 5  ;;  %v13_v6 = vrot.slane %v9_v3, 5 }
   0x4   :  { %v26_v4 = vsub.s32 4, %v25_v1  ;;  %v16_v11 = vmul.f32 %v12_v5, %v127_v2  ;;  %v17_v12 = vmul.f32 %v13_v6, %v9_v3 }
   0x6   :  { %v27_v7 = vrot.slane %v127_v2, %v26_v4  ;;  %v31_v8 = vrot.slane %v9_v3, %v26_v4  ;;  %v19_v17 = vsel %vm18_vm1, %v16_v11, 0.0  ;;  %v20_v18 = vsel %vm18_vm1, %v17_v12, 0.0 }
   0x7   :  { %v21_v20 = vadd.f32 %v20_v18, %v19_v17 }
   0x8   :  { %v32_v9 = vsub.f32 %v27_v7, %v127_v2  ;;  %v33_v10 = vsub.f32 %v31_v8, %v9_v3 }
   0xa   :  { %v34_v13 = vmul.f32 %v32_v9, %v32_v9  ;;  %v35_v14 = vmul.f32 %v33_v10, %v33_v10 }
   0xc   :  { %v37_v15 = vsel %vm36_vm0, %v34_v13, 0.0  ;;  %v38_v16 = vsel %vm36_vm0, %v35_v14, 0.0 }
   0xd   :  { %v39_v19 = vadd.f32 %v38_v16, %v37_v15 }
   0xf   :  { %40 = vadd.xlane.f32.xlu0 %v39_v19 }
  0x13   :  { %22 = vadd.xlane.f32.xlu0 %v21_v20 }
  0x9c   :  { %v41_v21 = vpop.xlane.xlu0 %40 }
  0x9d   :  { %106 = vrsqrt.f32 %v41_v21  ;;  %vm44_vm2 = vcmp.eq.f32.partialorder %v41_v21, inf  ;;  %v47_v24 = vand.u32 2147483648, %v41_v21  ;;  %vm46_vm3 = vcmp.eq.f32.partialorder %v41_v21, 0.0 }
  0xa0   :  { %v23_v30 = vpop.xlane.xlu0 %22 }
  0xa1   :  { %v63_v31 = vrot.slane %v23_v30, 1 }
  0xa7   :  { %v107_v22 = vpop.eup %106 }
  0xa8   :  { %v43_v23 = vmul.f32 %v107_v22, %v41_v21 }
  0xaa   :  { %v45_v25 = vsel %vm44_vm2, %v41_v21, %v43_v23 }
  0xab   :  { %v48_v26 = vsel %vm46_vm3, %v47_v24, %v45_v25 }
  0xac   :  { %v50_v27 = vrot.slane %v48_v26, 2 }
  0xae   :  { %92 = vpush %v50_v27  ;;  %v53_v28 = vrot.slane %v50_v27, 1 }
  0xb0   :  { %94 = vpush %v53_v28 }
  0xdf   :  { %s138_s0 = spop %92 }
  0xe1   :  { %s140_s10 = spop %94 }
  0xe2   :  { %s55_s11 = sadd.f32 %s140_s10, %s138_s0  ;;  %p61_p0 = scmp.gt.f32.partialorder %s138_s0, %s140_s10 }
  0xe4   :  { %v56_v29 = vstv %s55_s11 }
  0xe5   :  { %108 = vrcp.f32 %v56_v29 }
  0xef   :  { %v109_v32 = vpop.eup %108 }
  0xf0   :  { %96 = vpush %v109_v32 }
  0xf1   :  { %98 = vpush %v23_v30 }
  0xf2   :  { %100 = vpush %v63_v31 }
 0x121   :  { %s97_s12 = spop %96 }
 0x122   :  { %s99_s13 = spop %98  ;;  %s59_s18 = smul.f32 %s97_s12, %s138_s0 }
 0x123   :  { %s101_s14 = spop %100  ;;  %s60_s19 = smul.f32 %s97_s12, %s140_s10 }
 0x124   :  { %s158_s13 = smov (!%p61_p0, %s99_s13), %s101_s14  ;;  %v77_v38 = vstv %s59_s18 }
 0x125   :  { %s66_s15 = sxor.u32 2147483648, %s158_s13  ;;  %v78_v39 = vmul.f32 %v77_v38, %v127_v2  ;;  %v75_v40 = vstv %s60_s19 }
 0x126   :  { %v67_v33 = vstv %s66_s15  ;;  %v76_v42 = vmul.f32 %v75_v40, %v127_v2 }
 0x127   :  { %v68_v34 = vmul.f32 1.442695, %v67_v33  ;;  %v80_v41 = vrot.slane %v78_v39, 1 }
 0x129   :  { %110 = vpow2.f32 %v68_v34  ;;  %v82_v43 = vadd.f32 %v80_v41, %v76_v42 }
 0x133   :  { %v111_v35 = vpop.eup %110 }
 0x134   :  { %102 = vpush %v111_v35 }
 0x165   :  { %s103_s16 = spop %102 }
 0x166   :  { %s71_s17 = sadd.f32 1.0, %s103_s16 }
 0x168   :  { %v72_v36 = vstv %s71_s17 }
 0x169   :  { %112 = vrcp.f32 %v72_v36 }
 0x173   :  { %v113_v37 = vpop.eup %112 }
 0x174   :  { %104 = vpush %v113_v37 }
 0x1a5   :  { %s105_s20 = spop %104 }
 0x1a6   :  { %v83_v44 = vstv %s105_s20 }
 0x1a7   :  { %v84_v45 = vmul.f32 %v83_v44, %v82_v43 }
 0x1a9   :  { %v85_v46 = vmul.f32 %v84_v45, %v12_v5 }
 0x1ab   :  { %87 = vst.msk [vmem:[%s156_s1 - $0x2] sm:$0x4] %vm86_vm4, %v85_v46 }

</bundles_post_ra>
